<compile_context>
chip_gen: v6e
topology: v6e:2x2x1
jax: 0.10.0
libtpu: 0.0.40
codegen_flags: <defaults>
</compile_context>

<pallas_src>
import jax
import jax.numpy as jnp
from jax import lax
from jax.experimental import pallas as pl
from jax.experimental.pallas import tpu as pltpu

H1, H2 = 80, 10          # true hidden widths of the module
H1P, H2P = 128, 128      # lane-padded widths


def _round_up(a, b):
    return ((a + b - 1) // b) * b


def _lr_kernel(x_ref, w1_ref, w2_ref, c_ref, out_ref):
    # Packed constants: row 0 = b1, row 1 = b2, row 2 = w3, row 3[0] = b3.
    b1 = c_ref[0:1, :]                       # (1,128) f32
    b2 = c_ref[1:2, :]                       # (1,128) f32
    w3 = c_ref[2:3, :]                       # (1,128) f32
    b3 = c_ref[3:4, 0:1]                     # (1,1)   f32

    # fc_1 + ReLU  (dropout = identity in eval mode).
    # x arrives in its native dtype; cast to bf16 here for the MXU.
    x = x_ref[...].astype(jnp.bfloat16)
    h1 = jnp.dot(x, w1_ref[...], preferred_element_type=jnp.float32)
    h1 = jnp.maximum(h1 + b1, 0.0)           # (tm,128) f32

    # fc_2 + ReLU  (bf16 operands, f32 accumulate).
    h2 = jnp.dot(h1.astype(jnp.bfloat16), w2_ref[...],
                 preferred_element_type=jnp.float32)
    h2 = jnp.maximum(h2 + b2, 0.0)           # (tm,128) f32

    # fc_3 on the MXU, lane-dense: per 128-row block, contract w3 against the
    # block's feature dim (A @ B^T, flash-attention style) so the row index
    # lands in the lane dimension of the result:
    #   y[g, r] = sum_k w3[k] * h2[g*128 + r, k]
    tm = h2.shape[0]
    g = tm // 128
    h2r = h2.reshape(g, 128, H2P)                                   # layout-preserving split
    w3b = jnp.broadcast_to(w3.reshape(1, 1, H2P), (g, 1, H2P))      # (g,1,128)
    y = lax.dot_general(w3b, h2r,
                        dimension_numbers=(((2,), (2,)), ((0,), (0,))),
                        preferred_element_type=jnp.float32)          # (g,1,128)
    y = y.reshape(g, 128) + b3                                       # (g,128) f32
    out_ref[...] = y[None].astype(out_ref.dtype)                     # (1,g,128)


def _prepare_params(params):
    """bf16 matmul weights padded to 128 lanes + packed f32 constants."""
    w1, b1, w2, b2, w3, b3 = params
    dim = w1.shape[0]
    w1p = jnp.zeros((dim, H1P), jnp.bfloat16).at[:, :H1].set(w1.astype(jnp.bfloat16))
    w2p = jnp.zeros((H1P, H2P), jnp.bfloat16).at[:H1, :H2].set(w2.astype(jnp.bfloat16))
    c = jnp.zeros((8, 128), jnp.float32)
    c = c.at[0, :H1].set(b1.reshape(-1).astype(jnp.float32))
    c = c.at[1, :H2].set(b2.reshape(-1).astype(jnp.float32))
    c = c.at[2, :H2].set(w3.reshape(-1).astype(jnp.float32))
    c = c.at[3, 0].set(b3.reshape(()).astype(jnp.float32))
    return w1p, w2p, c


def _vmem_budget():
    """Generation-aware scoped-VMEM limit and physical capacity."""
    try:
        cap = int(pltpu.get_tpu_info().vmem_capacity_bytes)
    except Exception:
        cap = 64 * 1024 * 1024                      # conservative (v7x-sized) fallback
    if cap <= 0:
        cap = 64 * 1024 * 1024
    # v7x: 64 MiB physical -> 48 MiB limit; v5e/v6e: 128 MiB -> 96 MiB limit.
    limit = max(32 * 1024 * 1024, min(96 * 1024 * 1024, (cap * 3) // 4))
    return limit, cap


def lr_forward(x, params, *, tm=None):
    """Pallas implementation of LR.forward (eval mode). Returns shape (N,)."""
    n, dim = x.shape
    w1p, w2p, consts = _prepare_params(params)
    n128 = _round_up(max(n, 1), 128)

    vmem_limit, vmem_cap = _vmem_budget()
    # Heuristic: only v7x has <= 64 MiB VMEM, and it is the 2-TensorCore part.
    two_tc = vmem_cap <= 64 * 1024 * 1024

    # ---- batch-tile selection from the full per-step VMEM footprint ----
    if tm is None:
        itemsize = jnp.dtype(x.dtype).itemsize
        # per-row bytes: double-buffered native-dtype x tile + in-kernel bf16
        # copy + f32 h1/h2 intermediates (+ bf16 h1) + slack for temporaries.
        per_row = (2 * itemsize + 2) * dim + 2048
        tile_budget = (vmem_limit * 3) // 4          # headroom for weights / out / scratch
        tm = (tile_budget // per_row) // 128 * 128
        tm = max(128, min(8192, tm))                 # 8192: DMA-efficiency plateau
        tm = min(tm, n128)
        if two_tc and n128 >= 4 * 128:
            # v7x megacore: keep >= 4 grid steps so both cores pipeline.
            tm = min(tm, max(128, (n128 // 4) // 128 * 128))
    tm = max(128, (tm // 128) * 128)
    grid = pl.cdiv(n, tm)
    g = tm // 128

    out = pl.pallas_call(
        _lr_kernel,
        out_shape=jax.ShapeDtypeStruct((grid, g, 128), jnp.float32),
        grid_spec=pltpu.PrefetchScalarGridSpec(
            num_scalar_prefetch=0,
            grid=(grid,),
            in_specs=[
                pl.BlockSpec((tm, dim), lambda i: (i, 0)),     # x, native dtype, ragged edge
                pl.BlockSpec((dim, H1P), lambda i: (0, 0)),    # W1 (bf16, resident)
                pl.BlockSpec((H1P, H2P), lambda i: (0, 0)),    # W2 (bf16, resident)
                pl.BlockSpec((8, 128), lambda i: (0, 0)),      # packed b1/b2/w3/b3
            ],
            out_specs=pl.BlockSpec((1, g, 128), lambda i: (i, 0, 0)),
        ),
        compiler_params=pltpu.CompilerParams(
            dimension_semantics=("parallel",),
            vmem_limit_bytes=vmem_limit,
        ),
    )(x, w1p, w2p, consts)

    # lane-dense (grid, g, 128) slab -> flat rows -> drop the ragged tail;
    # this is torch's .squeeze(dim=1) plus removal of the edge-block garbage.
    return out.reshape(-1)[:n]


def init_params(key, dim):
    """Deterministic synthetic parameters matching nn.Linear shapes.

    PyTorch default Linear init (uniform(-1/sqrt(fan_in), 1/sqrt(fan_in))),
    weights stored as (in_features, out_features), biases as (out_features,).
    """
    def linear(k, fan_in, fan_out):
        kw, kb = jax.random.split(k)
        bound = 1.0 / (fan_in ** 0.5)
        w = jax.random.uniform(kw, (fan_in, fan_out), jnp.float32, -bound, bound)
        b = jax.random.uniform(kb, (fan_out,), jnp.float32, -bound, bound)
        return w, b

    k1, k2, k3 = jax.random.split(key, 3)
    w1, b1 = linear(k1, dim, H1)
    w2, b2 = linear(k2, H1, H2)
    w3, b3 = linear(k3, H2, 1)
    return (w1, b1, w2, b2, w3, b3)


def lr_reference(x, params):
    """Pure-JAX f32 reference of the eval-mode forward (matches the module)."""
    w1, b1, w2, b2, w3, b3 = params
    h = jnp.maximum(x @ w1 + b1, 0.0)
    h = jnp.maximum(h @ w2 + b2, 0.0)
    return (h @ w3 + b3)[:, 0]


if __name__ == "__main__":
    key = jax.random.PRNGKey(0)
    k_x, k_p = jax.random.split(key)

    # Small shapes; batch deliberately NOT a multiple of 128 to exercise the
    # ragged-edge (no-pad) path.
    batch, dim = 300, 32
    x = jax.random.normal(k_x, (batch, dim), jnp.float32)
    params = init_params(k_p, dim)

    y = lr_forward(x, params)
    jax.block_until_ready(y)

    y_ref = lr_reference(x, params)
    assert y.shape == (batch,)
    # bf16 streaming of x/W1/h1/W2 (f32 accumulate) => compare against the
    # exact f32 reference with a correspondingly loose tolerance.
    assert jnp.allclose(y, y_ref, atol=2e-2, rtol=2e-2), "mismatch vs reference"

    print("KERNEL_OK")
</pallas_src>

<mosaic_0001>
module attributes {stable_mosaic.version = 11 : i64} {
  func.func @_lr_kernel(%arg0: i32, %arg1: memref<384x32xf32, #tpu.memory_space<vmem>>, %arg2: memref<32x128xbf16, #tpu.memory_space<vmem>>, %arg3: memref<128x128xbf16, #tpu.memory_space<vmem>>, %arg4: memref<8x128xf32, #tpu.memory_space<vmem>>, %arg5: memref<1x3x128xf32, #tpu.memory_space<vmem>>) attributes {dimension_semantics = [#tpu.dimension_semantics<parallel>], iteration_bounds = array<i64: 1>, scalar_prefetch = 0 : i64, scratch_operands = 0 : i64, tpu.core_type = #tpu.core_type<tc>, window_params = [{transform_indices = @transform_0, window_bounds = array<i64: 384, 32>}, {pipeline_mode = #tpu.pipeline_mode<synchronous>, transform_indices = @transform_1, window_bounds = array<i64: 32, 128>}, {pipeline_mode = #tpu.pipeline_mode<synchronous>, transform_indices = @transform_2, window_bounds = array<i64: 128, 128>}, {pipeline_mode = #tpu.pipeline_mode<synchronous>, transform_indices = @transform_3, window_bounds = array<i64: 8, 128>}, {transform_indices = @transform_4, window_bounds = array<i64: 1, 3, 128>}]} {
    %c0 = arith.constant 0 : index
    %c0_0 = arith.constant 0 : index
    %0 = vector.load %arg4[%c0, %c0_0] : memref<8x128xf32, #tpu.memory_space<vmem>>, vector<1x128xf32>
    %c1 = arith.constant 1 : index
    %c0_1 = arith.constant 0 : index
    %1 = vector.load %arg4[%c1, %c0_1] : memref<8x128xf32, #tpu.memory_space<vmem>>, vector<1x128xf32>
    %c2 = arith.constant 2 : index
    %c0_2 = arith.constant 0 : index
    %2 = vector.load %arg4[%c2, %c0_2] : memref<8x128xf32, #tpu.memory_space<vmem>>, vector<1x128xf32>
    %c3 = arith.constant 3 : index
    %c0_3 = arith.constant 0 : index
    %3 = vector.load %arg4[%c3, %c0_3] : memref<8x128xf32, #tpu.memory_space<vmem>>, vector<1x1xf32>
    %c0_4 = arith.constant 0 : index
    %c0_5 = arith.constant 0 : index
    %4 = vector.load %arg1[%c0_4, %c0_5] : memref<384x32xf32, #tpu.memory_space<vmem>>, vector<384x32xf32>
    %5 = arith.truncf %4 : vector<384x32xf32> to vector<384x32xbf16>
    %c0_6 = arith.constant 0 : index
    %c0_7 = arith.constant 0 : index
    %6 = vector.load %arg2[%c0_6, %c0_7] : memref<32x128xbf16, #tpu.memory_space<vmem>>, vector<32x128xbf16>
    %cst = arith.constant dense<0.000000e+00> : vector<384x128xf32>
    %7 = tpu.matmul %5, %6, %cst {dimension_numbers = #tpu.dot_dimension_numbers<[1], [0], [0], [1], [0, 0, 1, 1], [], []>} : vector<384x32xbf16>, vector<32x128xbf16>, vector<384x128xf32> -> vector<384x128xf32>
    %8 = vector.broadcast %0 : vector<1x128xf32> to vector<384x128xf32>
    %9 = arith.addf %7, %8 : vector<384x128xf32>
    %cst_8 = arith.constant 0.000000e+00 : f32
    %10 = vector.broadcast %cst_8 : f32 to vector<384x128xf32>
    %11 = arith.maximumf %9, %10 : vector<384x128xf32>
    %12 = arith.truncf %11 : vector<384x128xf32> to vector<384x128xbf16>
    %c0_9 = arith.constant 0 : index
    %c0_10 = arith.constant 0 : index
    %13 = vector.load %arg3[%c0_9, %c0_10] : memref<128x128xbf16, #tpu.memory_space<vmem>>, vector<128x128xbf16>
    %cst_11 = arith.constant dense<0.000000e+00> : vector<384x128xf32>
    %14 = tpu.matmul %12, %13, %cst_11 {dimension_numbers = #tpu.dot_dimension_numbers<[1], [0], [0], [1], [0, 0, 1, 1], [], []>} : vector<384x128xbf16>, vector<128x128xbf16>, vector<384x128xf32> -> vector<384x128xf32>
    %15 = vector.broadcast %1 : vector<1x128xf32> to vector<384x128xf32>
    %16 = arith.addf %14, %15 : vector<384x128xf32>
    %cst_12 = arith.constant 0.000000e+00 : f32
    %17 = vector.broadcast %cst_12 : f32 to vector<384x128xf32>
    %18 = arith.maximumf %16, %17 : vector<384x128xf32>
    %19 = vector.shape_cast %18 : vector<384x128xf32> to vector<3x128x128xf32>
    %20 = vector.shape_cast %2 : vector<1x128xf32> to vector<1x1x128xf32>
    %21 = vector.shape_cast %20 : vector<1x1x128xf32> to vector<1x1x128xf32>
    %22 = vector.broadcast %21 : vector<1x1x128xf32> to vector<3x1x128xf32>
    %cst_13 = arith.constant dense<0.000000e+00> : vector<3x1x128xf32>
    %23 = tpu.matmul %22, %19, %cst_13 {dimension_numbers = #tpu.dot_dimension_numbers<[2], [2], [1], [1], [0, 0, 0, 1, 1, 1], [0], [0]>} : vector<3x1x128xf32>, vector<3x128x128xf32>, vector<3x1x128xf32> -> vector<3x1x128xf32>
    %24 = vector.shape_cast %23 : vector<3x1x128xf32> to vector<3x128xf32>
    %25 = vector.broadcast %3 : vector<1x1xf32> to vector<3x128xf32>
    %26 = arith.addf %24, %25 : vector<3x128xf32>
    %27 = vector.shape_cast %26 : vector<3x128xf32> to vector<1x3x128xf32>
    %c0_14 = arith.constant 0 : index
    %c0_15 = arith.constant 0 : index
    %c0_16 = arith.constant 0 : index
    %28 = vector.load %arg5[%c0_14, %c0_15, %c0_16] : memref<1x3x128xf32, #tpu.memory_space<vmem>>, vector<1x3x128xf32>
    tpu.vector_store %arg5[%c0_14, %c0_15, %c0_16], %27 {strides = array<i32>} : memref<1x3x128xf32, #tpu.memory_space<vmem>>, vector<1x3x128xf32>,
    return
  }
  func.func @transform_0(%arg0: i32) -> (i32, i32) {
    %c0_i32 = arith.constant 0 : i32
    %c0_i32_0 = arith.constant 0 : i32
    return %arg0, %c0_i32 : i32, i32
  }
  func.func @transform_1(%arg0: i32) -> (i32, i32) {
    %c0_i32 = arith.constant 0 : i32
    %c0_i32_0 = arith.constant 0 : i32
    %c0_i32_1 = arith.constant 0 : i32
    return %c0_i32, %c0_i32_0 : i32, i32
  }
  func.func @transform_2(%arg0: i32) -> (i32, i32) {
    %c0_i32 = arith.constant 0 : i32
    %c0_i32_0 = arith.constant 0 : i32
    %c0_i32_1 = arith.constant 0 : i32
    return %c0_i32, %c0_i32_0 : i32, i32
  }
  func.func @transform_3(%arg0: i32) -> (i32, i32) {
    %c0_i32 = arith.constant 0 : i32
    %c0_i32_0 = arith.constant 0 : i32
    %c0_i32_1 = arith.constant 0 : i32
    return %c0_i32, %c0_i32_0 : i32, i32
  }
  func.func @transform_4(%arg0: i32) -> (i32, i32, i32) {
    %c0_i32 = arith.constant 0 : i32
    %c0_i32_0 = arith.constant 0 : i32
    %c0_i32_1 = arith.constant 0 : i32
    return %arg0, %c0_i32, %c0_i32_0 : i32, i32, i32
  }
}

</mosaic_0001>

<bundles_post_ra>
// kernel: tpu_custom_call.1
= control target key start
LH: loop header
LB: loop body
LE: loop exit
PB: predicated region body
PF: predicated region fallthrough
CT: control target
= control target key end

     0   :  { %vm114_vm0 = vcmask 261120   ;;  %vm1442_vm1 = vmmov 0   ;;  %vm1046_vm2 = vcmask 1041409   ;;  %vm1049_vm3 = vcmask 1042434   ;;  %s1948_s1 = inlined_call_operand.vmem [shape: bf16[32,128], index: 1, kind: input, shape index: {}]   ;;  %s1949_s0 = inlined_call_operand.vmem [shape: f32[300,32], index: 0, kind: input, shape index: {}]   ;;  %s1950_s2 = inlined_call_operand.vmem [shape: bf16[128,128], index: 2, kind: input, shape index: {}]   ;;  %s1951_s3 = inlined_call_operand.vmem [shape: f32[8,128], index: 3, kind: input, shape index: {}]   ;;  %s1952_s4 = inlined_call_operand.vmem [shape: f32[1,3,128], index: 4, kind: output, shape index: {}]  }
   0x1   :  { %v1431_v0 = vld [vmem:[%s1948_s1 + $0x8] sm:$0xff]   ;;  %v1432_v1 = vld [vmem:[%s1948_s1] sm:$0xff]   ;;  %v24_v5 = vld [vmem:[%s1949_s0 + $0x10] sm:$0xff] }
   0x2   :  { %1202 = vmatprep.subr.bf16.mxu0 %v1431_v0  ;;  %v22_v2 = vld [vmem:[%s1949_s0] sm:$0xff]  ;;  %v23_v3 = vld [vmem:[%s1949_s0 + $0x8] sm:$0xff]  ;;  %1423 = vmatprep.subr.bf16.mxu1 %v1431_v0  ;;  %v25_v6 = vld [vmem:[%s1949_s0 + $0x18] sm:$0xff] }
   0x3   :  { %1203 = vmatpush3.bf16.msra.mxu0 %v1431_v0  ;;  %v70_v4 = vpack.c.bf16 %v23_v3, %v22_v2  ;;  %1425 = vmatpush3.bf16.msra.mxu1 %v1431_v0  ;;  %v26_v7 = vld [vmem:[%s1949_s0 + $0x20] sm:$0xff]  ;;  %v27_v8 = vld [vmem:[%s1949_s0 + $0x28] sm:$0xff]  ;;  %v71_v9 = vpack.c.bf16 %v25_v6, %v24_v5  ;;  %v28_v11 = vld [vmem:[%s1949_s0 + $0x30] sm:$0xff] }
   0x4   :  { %1204 = vmatprep.subr.bf16.mxu0 %v1432_v1  ;;  %1424 = vmatprep.subr.bf16.mxu1 %v1432_v1  ;;  %v72_v10 = vpack.c.bf16 %v27_v8, %v26_v7  ;;  %v29_v12 = vld [vmem:[%s1949_s0 + $0x38] sm:$0xff]  ;;  %v30_v13 = vld [vmem:[%s1949_s0 + $0x40] sm:$0xff]  ;;  %v31_v14 = vld [vmem:[%s1949_s0 + $0x48] sm:$0xff] }
   0x5   :  { %1206 = vmatprep.mubr.msk.bf16.mxu0 %vm114_vm0, %v70_v4  ;;  %v54_v15 = vld [vmem:[%s1949_s0 + $0x100] sm:$0xff]  ;;  %v55_v16 = vld [vmem:[%s1949_s0 + $0x108] sm:$0xff]  ;;  %v56_v17 = vld [vmem:[%s1949_s0 + $0x110] sm:$0xff]  ;;  %v73_v19 = vpack.c.bf16 %v29_v12, %v28_v11  ;;  %v74_v24 = vpack.c.bf16 %v31_v14, %v30_v13 }
   0x6   :  { %v57_v18 = vld [vmem:[%s1949_s0 + $0x118] sm:$0xff]  ;;  %v86_v20 = vpack.c.bf16 %v55_v16, %v54_v15  ;;  %v58_v22 = vld [vmem:[%s1949_s0 + $0x120] sm:$0xff]  ;;  %v59_v23 = vld [vmem:[%s1949_s0 + $0x128] sm:$0xff] }
   0x7   :  { %1205 = vmatpush3.bf16.msra.mxu0 %v1432_v1  ;;  %1426 = vmatpush3.bf16.msra.mxu1 %v1432_v1  ;;  %v87_v21 = vpack.c.bf16 %v57_v18, %v56_v17  ;;  %v88_v25 = vpack.c.bf16 %v59_v23, %v58_v22  ;;  %v60_v26 = vld [vmem:[%s1949_s0 + $0x130] sm:$0xff]  ;;  %v33_v28 = vld [vmem:[%s1949_s0 + $0x58] sm:$0xff]  ;;  %v62_v30 = vld [vmem:[%s1949_s0 + $0x140] sm:$0xff] }
   0x8   :  { %1238 = vmatprep.mubr.msk.bf16.mxu1 %vm114_vm0, %v86_v20  ;;  %v32_v27 = vld [vmem:[%s1949_s0 + $0x50] sm:$0xff]  ;;  %v61_v29 = vld [vmem:[%s1949_s0 + $0x138] sm:$0xff]  ;;  %v63_v31 = vld [vmem:[%s1949_s0 + $0x148] sm:$0xff] }
   0x9   :  { %v34_v32 = vld [vmem:[%s1949_s0 + $0x60] sm:$0xff]  ;;  %v1433_v33 = vld [vmem:[%s1950_s2 + $0x38] sm:$0xff]   ;;  %v1434_v34 = vld [vmem:[%s1950_s2 + $0x30] sm:$0xff]   ;;  %v89_v36 = vpack.c.bf16 %v61_v29, %v60_v26  ;;  %v75_v37 = vpack.c.bf16 %v33_v28, %v32_v27  ;;  %v90_v38 = vpack.c.bf16 %v63_v31, %v62_v30 }
   0xa   :  { %1207 = vmatmul.mubr.msk.bf16.vlgmr.msra.gmra.mxu0 %vm114_vm0, %v71_v9  ;;  %1239 = vmatmul.mubr.msk.bf16.vlgmr.msra.gmra.mxu1 %vm114_vm0, %v87_v21  ;;  %v35_v35 = vld [vmem:[%s1949_s0 + $0x68] sm:$0xff]  ;;  %v36_v41 = vld [vmem:[%s1949_s0 + $0x70] sm:$0xff]  ;;  %v65_v43 = vld [vmem:[%s1949_s0 + $0x158] sm:$0xff] }
   0xb   :  { %1210 = vmatprep.mubr.msk.bf16.mxu0 %vm114_vm0, %v72_v10  ;;  %1242 = vmatprep.mubr.msk.bf16.mxu1 %vm114_vm0, %v88_v25  ;;  %v1435_v39 = vld [vmem:[%s1950_s2 + $0x28] sm:$0xff]   ;;  %v76_v40 = vpack.c.bf16 %v35_v35, %v34_v32  ;;  %v64_v42 = vld [vmem:[%s1949_s0 + $0x150] sm:$0xff]  ;;  %v37_v44 = vld [vmem:[%s1949_s0 + $0x78] sm:$0xff] }
   0xc   :  { %1254 = vmatprep.subr.bf16.mxu1 %v1433_v33  ;;  %v66_v45 = vld [vmem:[%s1949_s0 + $0x160] sm:$0xff]  ;;  %v67_v46 = vld [vmem:[%s1949_s0 + $0x168] sm:$0xff]  ;;  %v91_v50 = vpack.c.bf16 %v65_v43, %v64_v42  ;;  %v77_v51 = vpack.c.bf16 %v37_v44, %v36_v41  ;;  %v1437_v54 = vld [vmem:[%s1950_s2 + $0x18] sm:$0xff]  }
   0xd   :  { %1255 = vmatpush3.bf16.msra.mxu1 %v1433_v33  ;;  %v38_v47 = vld [vmem:[%s1949_s0 + $0x80] sm:$0xff]  ;;  %v39_v48 = vld [vmem:[%s1949_s0 + $0x88] sm:$0xff]  ;;  %v92_v52 = vpack.c.bf16 %v67_v46, %v66_v45  ;;  %v68_v55 = vld [vmem:[%s1949_s0 + $0x170] sm:$0xff] }
   0xe   :  { %1256 = vmatprep.subr.bf16.mxu1 %v1434_v34  ;;  %v1436_v49 = vld [vmem:[%s1950_s2 + $0x20] sm:$0xff]   ;;  %v78_v53 = vpack.c.bf16 %v39_v48, %v38_v47  ;;  %v69_v56 = vld [vmem:[%s1949_s0 + $0x178] sm:$0xff]  ;;  %v40_v57 = vld [vmem:[%s1949_s0 + $0x90] sm:$0xff] }
   0xf   :  { %v41_v58 = vld [vmem:[%s1949_s0 + $0x98] sm:$0xff]  ;;  %v42_v59 = vld [vmem:[%s1949_s0 + $0xa0] sm:$0xff]  ;;  %v43_v60 = vld [vmem:[%s1949_s0 + $0xa8] sm:$0xff]  ;;  %v93_v61 = vpack.c.bf16 %v69_v56, %v68_v55 }
  0x10   :  { %v79_v62 = vpack.c.bf16 %v41_v58, %v40_v57  ;;  %v80_v63 = vpack.c.bf16 %v43_v60, %v42_v59  ;;  %v44_v0 = vld [vmem:[%s1949_s0 + $0xb0] sm:$0xff]  ;;  %v45_v1 = vld [vmem:[%s1949_s0 + $0xb8] sm:$0xff]  ;;  %v46_v2 = vld [vmem:[%s1949_s0 + $0xc0] sm:$0xff] }
  0x11   :  { %1257 = vmatpush3.bf16.msra.mxu1 %v1434_v34  ;;  %v47_v3 = vld [vmem:[%s1949_s0 + $0xc8] sm:$0xff]  ;;  %v81_v4 = vpack.c.bf16 %v45_v1, %v44_v0  ;;  %v48_v6 = vld [vmem:[%s1949_s0 + $0xd0] sm:$0xff]  ;;  %v49_v7 = vld [vmem:[%s1949_s0 + $0xd8] sm:$0xff] }
  0x12   :  { %1211 = vmatmul.mubr.msk.bf16.gmra.mxu0 %vm114_vm0, %v73_v19  ;;  %1243 = vmatmul.mubr.msk.bf16.gmra.mxu1 %vm114_vm0, %v89_v36  ;;  %v82_v5 = vpack.c.bf16 %v47_v3, %v46_v2  ;;  %v50_v8 = vld [vmem:[%s1949_s0 + $0xe0] sm:$0xff]  ;;  %v51_v9 = vld [vmem:[%s1949_s0 + $0xe8] sm:$0xff]  ;;  %v83_v10 = vpack.c.bf16 %v49_v7, %v48_v6  ;;  %v52_v12 = vld [vmem:[%s1949_s0 + $0xf0] sm:$0xff] }
  0x13   :  { %1214 = vmatprep.mubr.msk.bf16.mxu0 %vm114_vm0, %v74_v24  ;;  %1246 = vmatprep.mubr.msk.bf16.mxu1 %vm114_vm0, %v90_v38  ;;  %v84_v11 = vpack.c.bf16 %v51_v9, %v50_v8  ;;  %v53_v13 = vld [vmem:[%s1949_s0 + $0xf8] sm:$0xff]  ;;  %v1438_v15 = vld [vmem:[%s1950_s2 + $0x10] sm:$0xff]   ;;  %v1439_v16 = vld [vmem:[%s1950_s2 + $0x8] sm:$0xff]  }
  0x14   :  { %1258 = vmatprep.subr.bf16.mxu1 %v1435_v39  ;;  %v85_v14 = vpack.c.bf16 %v53_v13, %v52_v12  ;;  %v1440_v17 = vld [vmem:[%s1950_s2] sm:$0xff]  }
  0x15   :  { %1259 = vmatpush3.bf16.msra.mxu1 %v1435_v39  ;;  %v1669_v20 = vld [vmem:[%s1951_s3] ss:$0 sm:$0xff] }
  0x16   :  { %1260 = vmatprep.subr.bf16.mxu1 %v1436_v49 }
  0x19   :  { %1261 = vmatpush3.bf16.msra.mxu1 %v1436_v49 }
  0x1a   :  { %1215 = vmatmul.mubr.msk.bf16.gmra.mxu0 %vm114_vm0, %v75_v37  ;;  %1247 = vmatmul.mubr.msk.bf16.gmra.mxu1 %vm114_vm0, %v91_v50 }
  0x1b   :  { %1218 = vmatprep.mubr.msk.bf16.mxu0 %vm114_vm0, %v76_v40  ;;  %1250 = vmatprep.mubr.msk.bf16.mxu1 %vm114_vm0, %v92_v52 }
  0x1c   :  { %1262 = vmatprep.subr.bf16.mxu1 %v1437_v54 }
  0x1d   :  { %1263 = vmatpush3.bf16.msra.mxu1 %v1437_v54 }
  0x1e   :  { %1264 = vmatprep.subr.bf16.mxu1 %v1438_v15 }
  0x21   :  { %1265 = vmatpush3.bf16.msra.mxu1 %v1438_v15 }
  0x22   :  { %1219 = vmatmul.mubr.msk.bf16.gmra.mxu0 %vm114_vm0, %v77_v51  ;;  %1251 = vmatmul.mubr.msk.bf16.gmra.mxu1 %vm114_vm0, %v93_v61 }
  0x23   :  { %1222 = vmatprep.mubr.msk.bf16.mxu0 %vm114_vm0, %v78_v53  ;;  %1266 = vmatprep.subr.bf16.mxu1 %v1439_v16 }
  0x25   :  { %1267 = vmatpush3.bf16.msra.mxu1 %v1439_v16 }
  0x26   :  { %1268 = vmatprep.subr.bf16.mxu1 %v1440_v17 }
  0x29   :  { %1269 = vmatpush3.bf16.msra.mxu1 %v1440_v17 }
  0x2a   :  { %1223 = vmatmul.mubr.msk.bf16.gmra.mxu0 %vm114_vm0, %v79_v62 }
  0x2b   :  { %1226 = vmatprep.mubr.msk.bf16.mxu0 %vm114_vm0, %v80_v63 }
  0x32   :  { %1227 = vmatmul.mubr.msk.bf16.gmra.mxu0 %vm114_vm0, %v81_v4 }
  0x33   :  { %1230 = vmatprep.mubr.msk.bf16.mxu0 %vm114_vm0, %v82_v5 }
  0x3a   :  { %1231 = vmatmul.mubr.msk.bf16.gmra.mxu0 %vm114_vm0, %v83_v10 }
  0x3b   :  { %1234 = vmatprep.mubr.msk.bf16.mxu0 %vm114_vm0, %v84_v11 }
  0x42   :  { %1235 = vmatmul.mubr.msk.bf16.gmra.mxu0 %vm114_vm0, %v85_v14 }
  0xca   :  { %v1208_v18 = vpop.f32.mrf.mxu0  ;;  %v1679_v50 = vpop.f32.mrf.mxu1 }
  0xcb   :  { %v230_v24 = vadd.f32 %v1208_v18, %v1669_v20 }
  0xcc   :  { %v221_v19 = vpop.f32.mrf.mxu0  ;;  %v1685_v58 = vpop.f32.mrf.mxu1 }
  0xcd   :  { %v222_v22 = vadd.f32 %v1669_v20, %v221_v19  ;;  %v414_v31 = vmax.f32 %v230_v24, 0.0 }
  0xce   :  { %v1209_v21 = vpop.f32.mrf.mxu0  ;;  %v1687_v2 = vpop.f32.mrf.mxu1 }
  0xcf   :  { %v233_v23 = vadd.f32 %v1209_v21, %v1669_v20  ;;  %v412_v29 = vmax.f32 %v222_v22, 0.0 }
  0xd0   :  { %v224_v25 = vpop.f32.mrf.mxu0  ;;  %v352_v10 = vpop.f32.mrf.mxu1 }
  0xd1   :  { %v225_v26 = vadd.f32 %v1669_v20, %v224_v25  ;;  %v415_v27 = vmax.f32 %v233_v23, 0.0 }
  0xd2   :  { %v1212_v28 = vpop.f32.mrf.mxu0  ;;  %v1693_v18 = vpop.f32.mrf.mxu1 }
  0xd3   :  { %v413_v30 = vmax.f32 %v225_v26, 0.0  ;;  %v461_v34 = vpack.c.bf16 %v415_v27, %v414_v31  ;;  %v246_v38 = vadd.f32 %v1212_v28, %v1669_v20 }
  0xd4   :  { %v237_v32 = vpop.f32.mrf.mxu0  ;;  %v1699_v27 = vpop.f32.mrf.mxu1 }
  0xd5   :  { %v460_v33 = vpack.c.bf16 %v413_v30, %v412_v29  ;;  %v238_v36 = vadd.f32 %v1669_v20, %v237_v32  ;;  %v418_v45 = vmax.f32 %v246_v38, 0.0 }
  0xd6   :  { %v1213_v35 = vpop.f32.mrf.mxu0 }
  0xd7   :  { %v249_v37 = vadd.f32 %v1213_v35, %v1669_v20  ;;  %1270 = vmatprep.mubr.bf16.mxu1 %v460_v33  ;;  %v416_v43 = vmax.f32 %v238_v36, 0.0  ;;  %v1701_v35 = vpop.f32.mrf.mxu1 }
  0xd8   :  { %v240_v39 = vpop.f32.mrf.mxu0  ;;  %1271 = vmatmul.mubr.bf16.vlgmr.msra.gmra.mxu1 %v461_v34 }
  0xd9   :  { %v241_v40 = vadd.f32 %v1669_v20, %v240_v39  ;;  %v419_v41 = vmax.f32 %v249_v37, 0.0 }
  0xda   :  { %v1216_v42 = vpop.f32.mrf.mxu0 }
  0xdb   :  { %v417_v44 = vmax.f32 %v241_v40, 0.0  ;;  %v463_v48 = vpack.c.bf16 %v419_v41, %v418_v45  ;;  %v262_v53 = vadd.f32 %v1216_v42, %v1669_v20 }
  0xdc   :  { %v253_v46 = vpop.f32.mrf.mxu0 }
  0xdd   :  { %v462_v47 = vpack.c.bf16 %v417_v44, %v416_v43  ;;  %v254_v51 = vadd.f32 %v1669_v20, %v253_v46  ;;  %v422_v61 = vmax.f32 %v262_v53, 0.0  ;;  %v368_v43 = vpop.f32.mrf.mxu1 }
  0xde   :  { %v1217_v49 = vpop.f32.mrf.mxu0 }
  0xdf   :  { %v265_v52 = vadd.f32 %v1217_v49, %v1669_v20  ;;  %1274 = vmatprep.mubr.bf16.mxu1 %v462_v47  ;;  %v420_v59 = vmax.f32 %v254_v51, 0.0 }
  0xe0   :  { %v256_v54 = vpop.f32.mrf.mxu0  ;;  %1275 = vmatmul.mubr.bf16.gmra.mxu1 %v463_v48 }
  0xe1   :  { %v257_v55 = vadd.f32 %v1669_v20, %v256_v54  ;;  %v423_v56 = vmax.f32 %v265_v52, 0.0  ;;  %v1707_v52 = vpop.f32.mrf.mxu1 }
  0xe2   :  { %v1220_v57 = vpop.f32.mrf.mxu0 }
  0xe3   :  { %v421_v60 = vmax.f32 %v257_v55, 0.0  ;;  %v465_v0 = vpack.c.bf16 %v423_v56, %v422_v61  ;;  %v278_v5 = vadd.f32 %v1220_v57, %v1669_v20  ;;  %v381_v61 = vpop.f32.mrf.mxu1 }
  0xe4   :  { %v269_v62 = vpop.f32.mrf.mxu0 }
  0xe5   :  { %v464_v63 = vpack.c.bf16 %v421_v60, %v420_v59  ;;  %v270_v3 = vadd.f32 %v1669_v20, %v269_v62  ;;  %v426_v13 = vmax.f32 %v278_v5, 0.0  ;;  %v353_v5 = vadd.f32 %v1669_v20, %v352_v10 }
  0xe6   :  { %v1221_v1 = vpop.f32.mrf.mxu0 }
  0xe7   :  { %v281_v4 = vadd.f32 %v1221_v1, %v1669_v20  ;;  %1278 = vmatprep.mubr.bf16.mxu1 %v464_v63  ;;  %v424_v11 = vmax.f32 %v270_v3, 0.0 }
  0xe8   :  { %v272_v6 = vpop.f32.mrf.mxu0  ;;  %1279 = vmatmul.mubr.bf16.gmra.mxu1 %v465_v0 }
  0xe9   :  { %v273_v7 = vadd.f32 %v1669_v20, %v272_v6  ;;  %v427_v8 = vmax.f32 %v281_v4, 0.0  ;;  %v350_v4 = vadd.f32 %v1669_v20, %v1685_v58 }
  0xea   :  { %v1224_v9 = vpop.f32.mrf.mxu0 }
  0xeb   :  { %v425_v12 = vmax.f32 %v273_v7, 0.0  ;;  %v467_v16 = vpack.c.bf16 %v427_v8, %v426_v13  ;;  %v294_v22 = vadd.f32 %v1224_v9, %v1669_v20  ;;  %v1249_v8 = vpop.f32.mrf.mxu1 }
  0xec   :  { %v285_v14 = vpop.f32.mrf.mxu0 }
  0xed   :  { %v466_v15 = vpack.c.bf16 %v425_v12, %v424_v11  ;;  %v286_v19 = vadd.f32 %v1669_v20, %v285_v14  ;;  %v430_v30 = vmax.f32 %v294_v22, 0.0  ;;  %v384_v58 = vpop.f32.mrf.mxu1 }
  0xee   :  { %v1225_v17 = vpop.f32.mrf.mxu0 }
  0xef   :  { %v297_v21 = vadd.f32 %v1225_v17, %v1669_v20  ;;  %1282 = vmatprep.mubr.bf16.mxu1 %v466_v15  ;;  %v428_v28 = vmax.f32 %v286_v19, 0.0  ;;  %v444_v15 = vmax.f32 %v350_v4, 0.0 }
  0xf0   :  { %v288_v23 = vpop.f32.mrf.mxu0  ;;  %1283 = vmatmul.mubr.bf16.gmra.mxu1 %v467_v16  ;;  %v445_v16 = vmax.f32 %v353_v5, 0.0 }
  0xf1   :  { %v289_v24 = vadd.f32 %v1669_v20, %v288_v23  ;;  %v431_v25 = vmax.f32 %v297_v21, 0.0 }
  0xf2   :  { %v1228_v26 = vpop.f32.mrf.mxu0  ;;  %v476_v23 = vpack.c.bf16 %v445_v16, %v444_v15  ;;  %v1763_v15 = vld [vmem:[%s1951_s3 + $0x1] ss:$0 sm:$0xff] }
  0xf3   :  { %v429_v29 = vmax.f32 %v289_v24, 0.0  ;;  %v469_v33 = vpack.c.bf16 %v431_v25, %v430_v30  ;;  %v310_v38 = vadd.f32 %v1228_v26, %v1669_v20  ;;  %v366_v24 = vadd.f32 %v1669_v20, %v1699_v27  ;;  %v1252_v30 = vpop.f32.mrf.mxu1 }
  0xf4   :  { %v301_v31 = vpop.f32.mrf.mxu0  ;;  %v369_v25 = vadd.f32 %v1669_v20, %v368_v43  ;;  %v382_v27 = vadd.f32 %v1669_v20, %v381_v61 }
  0xf5   :  { %v468_v32 = vpack.c.bf16 %v429_v29, %v428_v28  ;;  %v302_v36 = vadd.f32 %v1669_v20, %v301_v31  ;;  %v434_v46 = vmax.f32 %v310_v38, 0.0  ;;  %v358_v28 = vadd.f32 %v1679_v50, %v1669_v20 }
  0xf6   :  { %v1229_v34 = vpop.f32.mrf.mxu0  ;;  %v361_v29 = vadd.f32 %v1687_v2, %v1669_v20  ;;  %v448_v31 = vmax.f32 %v366_v24, 0.0  ;;  %v385_v38 = vadd.f32 %v1669_v20, %v384_v58  ;;  %v374_v50 = vadd.f32 %v1693_v18, %v1669_v20 }
  0xf7   :  { %v313_v37 = vadd.f32 %v1229_v34, %v1669_v20  ;;  %1286 = vmatprep.mubr.bf16.mxu1 %v468_v32  ;;  %v432_v44 = vmax.f32 %v302_v36, 0.0  ;;  %v449_v32 = vmax.f32 %v369_v25, 0.0  ;;  %v397_v36 = vpop.f32.mrf.mxu1  ;;  %v377_v2 = vadd.f32 %v1701_v35, %v1669_v20 }
  0xf8   :  { %v304_v39 = vpop.f32.mrf.mxu0  ;;  %1287 = vmatmul.mubr.bf16.gmra.mxu1 %v469_v33  ;;  %v446_v33 = vmax.f32 %v358_v28, 0.0  ;;  %v447_v34 = vmax.f32 %v361_v29, 0.0  ;;  %v450_v43 = vmax.f32 %v374_v50, 0.0  ;;  %v390_v18 = vadd.f32 %v1707_v52, %v1669_v20 }
  0xf9   :  { %v305_v40 = vadd.f32 %v1669_v20, %v304_v39  ;;  %v435_v41 = vmax.f32 %v313_v37, 0.0  ;;  %v478_v37 = vpack.c.bf16 %v449_v32, %v448_v31  ;;  %v1441_v52 = vmov 0.0  }
  0xfa   :  { %v1232_v42 = vpop.f32.mrf.mxu0  ;;  %v477_v39 = vpack.c.bf16 %v447_v34, %v446_v33  ;;  %1318 = vmatprep.subr.mxu0 %v1441_v52  ;;  %1353 = vmatprep.subr.mxu1 %v1441_v52 }
  0xfb   :  { %v433_v45 = vmax.f32 %v305_v40, 0.0  ;;  %v471_v49 = vpack.c.bf16 %v435_v41, %v434_v46  ;;  %v326_v55 = vadd.f32 %v1232_v42, %v1669_v20  ;;  %v1253_v40 = vpop.f32.mrf.mxu1  ;;  %v452_v41 = vmax.f32 %v382_v27, 0.0  ;;  %1350 = vmatprep.mubr.msk.f32.mxu0 %vm1442_vm1, %v1441_v52 }
  0xfc   :  { %v317_v47 = vpop.f32.mrf.mxu0  ;;  %v453_v42 = vmax.f32 %v385_v38, 0.0 }
  0xfd   :  { %v470_v48 = vpack.c.bf16 %v433_v45, %v432_v44  ;;  %v318_v53 = vadd.f32 %v1669_v20, %v317_v47  ;;  %v438_v0 = vmax.f32 %v326_v55, 0.0  ;;  %v451_v44 = vmax.f32 %v377_v2, 0.0  ;;  %v400_v45 = vpop.f32.mrf.mxu1 }
  0xfe   :  { %v1233_v51 = vpop.f32.mrf.mxu0  ;;  %v480_v46 = vpack.c.bf16 %v453_v42, %v452_v41  ;;  %v398_v47 = vadd.f32 %v1669_v20, %v397_v36 }
  0xff   :  { %v329_v54 = vadd.f32 %v1233_v51, %v1669_v20  ;;  %1290 = vmatprep.mubr.bf16.mxu1 %v470_v48  ;;  %v436_v62 = vmax.f32 %v318_v53, 0.0  ;;  %v401_v48 = vadd.f32 %v1669_v20, %v400_v45  ;;  %v393_v51 = vadd.f32 %v1249_v8, %v1669_v20 }
 0x100   :  { %v320_v56 = vpop.f32.mrf.mxu0  ;;  %1291 = vmatmul.mubr.bf16.gmra.mxu1 %v471_v49  ;;  %v479_v49 = vpack.c.bf16 %v451_v44, %v450_v43  ;;  %v456_v35 = vmax.f32 %v398_v47, 0.0 }
 0x101   :  { %v321_v57 = vadd.f32 %v1669_v20, %v320_v56  ;;  %v439_v59 = vmax.f32 %v329_v54, 0.0  ;;  %v457_v53 = vmax.f32 %v401_v48, 0.0  ;;  %v454_v54 = vmax.f32 %v390_v18, 0.0 }
 0x102   :  { %v1236_v60 = vpop.f32.mrf.mxu0  ;;  %v455_v55 = vmax.f32 %v393_v51, 0.0 }
 0x103   :  { %v437_v63 = vmax.f32 %v321_v57, 0.0  ;;  %v473_v6 = vpack.c.bf16 %v439_v59, %v438_v0  ;;  %v342_v12 = vadd.f32 %v1236_v60, %v1669_v20  ;;  %v482_v56 = vpack.c.bf16 %v457_v53, %v456_v35 }
 0x104   :  { %v333_v1 = vpop.f32.mrf.mxu0  ;;  %v481_v57 = vpack.c.bf16 %v455_v55, %v454_v54  ;;  %v406_v59 = vadd.f32 %v1252_v30, %v1669_v20  ;;  %v409_v60 = vadd.f32 %v1253_v40, %v1669_v20 }
 0x105   :  { %v472_v3 = vpack.c.bf16 %v437_v63, %v436_v62  ;;  %v334_v9 = vadd.f32 %v1669_v20, %v333_v1  ;;  %v442_v21 = vmax.f32 %v342_v12, 0.0 }
 0x106   :  { %v1237_v7 = vpop.f32.mrf.mxu0  ;;  %v458_v61 = vmax.f32 %v406_v59, 0.0  ;;  %v459_v62 = vmax.f32 %v409_v60, 0.0 }
 0x107   :  { %v345_v11 = vadd.f32 %v1237_v7, %v1669_v20  ;;  %1294 = vmatprep.mubr.bf16.mxu1 %v472_v3  ;;  %v440_v19 = vmax.f32 %v334_v9, 0.0 }
 0x108   :  { %v336_v13 = vpop.f32.mrf.mxu0  ;;  %1295 = vmatmul.mubr.bf16.gmra.mxu1 %v473_v6  ;;  %v483_v63 = vpack.c.bf16 %v459_v62, %v458_v61 }
 0x109   :  { %v337_v14 = vadd.f32 %v1669_v20, %v336_v13  ;;  %v443_v17 = vmax.f32 %v345_v11, 0.0 }
 0x10b   :  { %v441_v10 = vmax.f32 %v337_v14, 0.0  ;;  %v475_v26 = vpack.c.bf16 %v443_v17, %v442_v21 }
 0x10d   :  { %v474_v22 = vpack.c.bf16 %v441_v10, %v440_v19 }
 0x10f   :  { %1298 = vmatprep.mubr.bf16.mxu1 %v474_v22  ;;  %v21_v22 = vld [vmem:[%s1951_s3 + $0x3] sm:$0x1] }
 0x110   :  { %1299 = vmatmul.mubr.bf16.gmra.mxu1 %v475_v26  ;;  %1427 = vpush %v21_v22 }
 0x111   :  { %1302 = vmatprep.mubr.bf16.mxu1 %v476_v23 }
 0x118   :  { %1303 = vmatmul.mubr.bf16.gmra.mxu1 %v477_v39 }
 0x119   :  { %1306 = vmatprep.mubr.bf16.mxu1 %v478_v37 }
 0x120   :  { %1307 = vmatmul.mubr.bf16.gmra.mxu1 %v479_v49 }
 0x121   :  { %1310 = vmatprep.mubr.bf16.mxu1 %v480_v46 }
 0x128   :  { %1311 = vmatmul.mubr.bf16.gmra.mxu1 %v481_v57 }
 0x129   :  { %1314 = vmatprep.mubr.bf16.mxu1 %v482_v56 }
 0x130   :  { %1315 = vmatmul.mubr.bf16.gmra.mxu1 %v483_v63 }
 0x131   :  { %1385 = vmatprep.mubr.msk.f32.mxu1 %vm1442_vm1, %v1441_v52 }
 0x198   :  { %v1746_v0 = vpop.f32.mrf.mxu1 }
 0x19a   :  { %v1748_v20 = vpop.f32.mrf.mxu1 }
 0x19c   :  { %v1750_v1 = vpop.f32.mrf.mxu1 }
 0x19e   :  { %v1752_v3 = vpop.f32.mrf.mxu1 }
 0x1a0   :  { %v1754_v4 = vpop.f32.mrf.mxu1 }
 0x1a1   :  { %v611_v35 = vadd.f32 %v1754_v4, %v1763_v15 }
 0x1a2   :  { %v1756_v5 = vpop.f32.mrf.mxu1 }
 0x1a3   :  { %v783_v59 = vmax.f32 %v611_v35, 0.0 }
 0x1a4   :  { %v1277_v6 = vpop.f32.mrf.mxu1 }
 0x1a5   :  { %v614_v47 = vadd.f32 %v1277_v6, %v1763_v15  ;;  %v603_v6 = vadd.f32 %v1763_v15, %v1756_v5 }
 0x1a6   :  { %v1758_v7 = vpop.f32.mrf.mxu1 }
 0x1a7   :  { %v784_v53 = vmax.f32 %v614_v47, 0.0  ;;  %v606_v60 = vadd.f32 %v1763_v15, %v1758_v7 }
 0x1a8   :  { %v1280_v8 = vpop.f32.mrf.mxu1 }
 0x1a9   :  { %v627_v27 = vadd.f32 %v1280_v8, %v1763_v15  ;;  %v782_v8 = vmax.f32 %v606_v60, 0.0 }
 0x1aa   :  { %v618_v9 = vpop.f32.mrf.mxu1 }
 0x1ab   :  { %v787_v2 = vmax.f32 %v627_v27, 0.0  ;;  %v619_v43 = vadd.f32 %v1763_v15, %v618_v9 }
 0x1ac   :  { %v1281_v11 = vpop.f32.mrf.mxu1 }
 0x1ad   :  { %v630_v33 = vadd.f32 %v1281_v11, %v1763_v15  ;;  %v785_v48 = vmax.f32 %v619_v43, 0.0 }
 0x1ae   :  { %v621_v12 = vpop.f32.mrf.mxu1 }
 0x1af   :  { %v788_v38 = vmax.f32 %v630_v33, 0.0  ;;  %v622_v40 = vadd.f32 %v1763_v15, %v621_v12 }
 0x1b0   :  { %v1284_v13 = vpop.f32.mrf.mxu1 }
 0x1b1   :  { %v643_v19 = vadd.f32 %v1284_v13, %v1763_v15  ;;  %v786_v44 = vmax.f32 %v622_v40, 0.0  ;;  %v598_v13 = vadd.f32 %v1750_v1, %v1763_v15 }
 0x1b2   :  { %v634_v14 = vpop.f32.mrf.mxu1 }
 0x1b3   :  { %v791_v24 = vmax.f32 %v643_v19, 0.0  ;;  %v635_v29 = vadd.f32 %v1763_v15, %v634_v14  ;;  %v781_v14 = vmax.f32 %v603_v6, 0.0  ;;  %v595_v19 = vadd.f32 %v1746_v0, %v1763_v15 }
 0x1b4   :  { %v1285_v16 = vpop.f32.mrf.mxu1 }
 0x1b5   :  { %v646_v17 = vadd.f32 %v1285_v16, %v1763_v15  ;;  %v789_v34 = vmax.f32 %v635_v29, 0.0  ;;  %v779_v29 = vmax.f32 %v595_v19, 0.0 }
 0x1b6   :  { %v637_v58 = vpop.f32.mrf.mxu1 }
 0x1b7   :  { %v792_v10 = vmax.f32 %v646_v17, 0.0  ;;  %v638_v25 = vadd.f32 %v1763_v15, %v637_v58 }
 0x1b8   :  { %v1767_v21 = vpop.f32.mrf.mxu1 }
 0x1b9   :  { %1319 = vmatpush3.xpose.msra.mxu0 %v792_v10  ;;  %v790_v30 = vmax.f32 %v638_v25, 0.0  ;;  %v780_v10 = vmax.f32 %v598_v13, 0.0 }
 0x1ba   :  { %v1772_v23 = vpop.f32.mrf.mxu1  ;;  %1320 = vmatprep.subr.mxu0 %v1441_v52 }
 0x1bc   :  { %v1776_v26 = vpop.f32.mrf.mxu1 }
 0x1bd   :  { %1321 = vmatpush3.xpose.msra.mxu0 %v791_v24 }
 0x1be   :  { %v1778_v28 = vpop.f32.mrf.mxu1  ;;  %1322 = vmatprep.subr.mxu0 %v1441_v52 }
 0x1c0   :  { %v1782_v31 = vpop.f32.mrf.mxu1 }
 0x1c1   :  { %1323 = vmatpush3.xpose.msra.mxu0 %v790_v30  ;;  %v590_v30 = vadd.f32 %v1763_v15, %v1752_v3 }
 0x1c2   :  { %v1784_v32 = vpop.f32.mrf.mxu1  ;;  %1324 = vmatprep.subr.mxu0 %v1441_v52 }
 0x1c4   :  { %v1788_v36 = vpop.f32.mrf.mxu1 }
 0x1c5   :  { %1325 = vmatpush3.xpose.msra.mxu0 %v789_v34  ;;  %v678_v43 = vadd.f32 %v1788_v36, %v1763_v15 }
 0x1c6   :  { %v1790_v37 = vpop.f32.mrf.mxu1  ;;  %1326 = vmatprep.subr.mxu0 %v1441_v52 }
 0x1c7   :  { %v800_v47 = vmax.f32 %v678_v43, 0.0 }
 0x1c8   :  { %v1794_v39 = vpop.f32.mrf.mxu1 }
 0x1c9   :  { %1327 = vmatpush3.xpose.msra.mxu0 %v788_v38  ;;  %v691_v1 = vadd.f32 %v1794_v39, %v1763_v15  ;;  %v587_v38 = vadd.f32 %v1763_v15, %v1748_v20  ;;  %v778_v39 = vmax.f32 %v590_v30, 0.0 }
 0x1ca   :  { %v1796_v50 = vpop.f32.mrf.mxu1  ;;  %1328 = vmatprep.subr.mxu0 %v1441_v52 }
 0x1cb   :  { %v803_v0 = vmax.f32 %v691_v1, 0.0  ;;  %v683_v3 = vadd.f32 %v1763_v15, %v1796_v50  ;;  %v1874_v50 = vld [vmem:[%s1951_s3 + $0x2] sm:$0x1]  ;;  %s1428_s3 = spop %1427 }
 0x1cc   :  { %v1297_v41 = vpop.f32.mrf.mxu1 }
 0x1cd   :  { %1329 = vmatpush3.xpose.msra.mxu0 %v787_v2  ;;  %v694_v5 = vadd.f32 %v1297_v41, %v1763_v15 }
 0x1ce   :  { %v1800_v42 = vpop.f32.mrf.mxu1  ;;  %1330 = vmatprep.subr.mxu0 %v1441_v52 }
 0x1cf   :  { %v804_v22 = vmax.f32 %v694_v5, 0.0  ;;  %v686_v33 = vadd.f32 %v1763_v15, %v1800_v42  ;;  %v777_v42 = vmax.f32 %v587_v38, 0.0 }
 0x1d0   :  { %v1300_v45 = vpop.f32.mrf.mxu1 }
 0x1d1   :  { %1331 = vmatpush3.xpose.msra.mxu0 %v786_v44  ;;  %v707_v54 = vadd.f32 %v1300_v45, %v1763_v15  ;;  %v802_v2 = vmax.f32 %v686_v33, 0.0  ;;  %v801_v44 = vmax.f32 %v683_v3, 0.0 }
 0x1d2   :  { %v698_v46 = vpop.f32.mrf.mxu1  ;;  %1332 = vmatprep.subr.mxu0 %v1441_v52 }
 0x1d3   :  { %v807_v61 = vmax.f32 %v707_v54, 0.0  ;;  %v699_v9 = vadd.f32 %v1763_v15, %v698_v46  ;;  %v675_v46 = vadd.f32 %v1782_v31, %v1763_v15 }
 0x1d4   :  { %v1301_v49 = vpop.f32.mrf.mxu1 }
 0x1d5   :  { %v710_v18 = vadd.f32 %v1301_v49, %v1763_v15  ;;  %1333 = vmatpush3.xpose.msra.mxu0 %v785_v48  ;;  %v805_v16 = vmax.f32 %v699_v9, 0.0 }
 0x1d6   :  { %v701_v51 = vpop.f32.mrf.mxu1  ;;  %1334 = vmatprep.subr.mxu0 %v1441_v52 }
 0x1d7   :  { %v808_v55 = vmax.f32 %v710_v18, 0.0  ;;  %v702_v62 = vadd.f32 %v1763_v15, %v701_v51  ;;  %v799_v18 = vmax.f32 %v675_v46, 0.0  ;;  %v670_v51 = vadd.f32 %v1763_v15, %v1790_v37 }
 0x1d8   :  { %v1811_v56 = vpop.f32.mrf.mxu1  ;;  %v662_v37 = vadd.f32 %v1776_v26, %v1763_v15 }
 0x1d9   :  { %1335 = vmatpush3.xpose.msra.mxu0 %v784_v53  ;;  %1354 = vmatpush3.xpose.msra.mxu1 %v808_v55  ;;  %v806_v7 = vmax.f32 %v702_v62, 0.0  ;;  %v667_v53 = vadd.f32 %v1763_v15, %v1784_v32  ;;  %v798_v54 = vmax.f32 %v670_v51, 0.0  ;;  %v659_v32 = vadd.f32 %v1767_v21, %v1763_v15 }
 0x1da   :  { %v1813_v57 = vpop.f32.mrf.mxu1  ;;  %1336 = vmatprep.subr.mxu0 %v1441_v52  ;;  %1355 = vmatprep.subr.mxu1 %v1441_v52  ;;  %v796_v6 = vmax.f32 %v662_v37, 0.0  ;;  %v651_v21 = vadd.f32 %v1763_v15, %v1772_v23 }
 0x1db   :  { %v797_v60 = vmax.f32 %v667_v53, 0.0  ;;  %v795_v26 = vmax.f32 %v659_v32, 0.0 }
 0x1dc   :  { %v1820_v63 = vpop.f32.mrf.mxu1 }
 0x1dd   :  { %1337 = vmatpush3.xpose.msra.mxu0 %v783_v59  ;;  %1356 = vmatpush3.xpose.msra.mxu1 %v807_v61 }
 0x1de   :  { %v1822_v4 = vpop.f32.mrf.mxu1  ;;  %1338 = vmatprep.subr.mxu0 %v1441_v52  ;;  %1357 = vmatprep.subr.mxu1 %v1441_v52 }
 0x1e0   :  { %v1829_v11 = vpop.f32.mrf.mxu1 }
 0x1e1   :  { %1339 = vmatpush3.xpose.msra.mxu0 %v782_v8  ;;  %1358 = vmatpush3.xpose.msra.mxu1 %v806_v7  ;;  %v654_v7 = vadd.f32 %v1763_v15, %v1778_v28  ;;  %v793_v28 = vmax.f32 %v651_v21, 0.0  ;;  %v739_v23 = vadd.f32 %v1829_v11, %v1763_v15  ;;  %v726_v11 = vadd.f32 %v1820_v63, %v1763_v15 }
 0x1e2   :  { %v1831_v12 = vpop.f32.mrf.mxu1  ;;  %1340 = vmatprep.subr.mxu0 %v1441_v52  ;;  %1359 = vmatprep.subr.mxu1 %v1441_v52  ;;  %v715_v63 = vadd.f32 %v1763_v15, %v1813_v57 }
 0x1e3   :  { %v794_v5 = vmax.f32 %v654_v7, 0.0 }
 0x1e4   :  { %v1838_v17 = vpop.f32.mrf.mxu1 }
 0x1e5   :  { %1341 = vmatpush3.xpose.msra.mxu0 %v781_v14  ;;  %1360 = vmatpush3.xpose.msra.mxu1 %v805_v16 }
 0x1e6   :  { %v1840_v58 = vpop.f32.mrf.mxu1  ;;  %1342 = vmatprep.subr.mxu0 %v1441_v52  ;;  %1361 = vmatprep.subr.mxu1 %v1441_v52 }
 0x1e8   :  { %v1848_v24 = vpop.f32.mrf.mxu1 }
 0x1e9   :  { %1343 = vmatpush3.xpose.msra.mxu0 %v780_v10  ;;  %1362 = vmatpush3.xpose.msra.mxu1 %v804_v22  ;;  %v755_v8 = vadd.f32 %v1848_v24, %v1763_v15  ;;  %v742_v10 = vadd.f32 %v1838_v17, %v1763_v15  ;;  %v815_v24 = vmax.f32 %v739_v23, 0.0  ;;  %v731_v17 = vadd.f32 %v1763_v15, %v1831_v12 }
 0x1ea   :  { %v1850_v25 = vpop.f32.mrf.mxu1  ;;  %1344 = vmatprep.subr.mxu0 %v1441_v52  ;;  %1363 = vmatprep.subr.mxu1 %v1441_v52  ;;  %v718_v12 = vadd.f32 %v1763_v15, %v1822_v4  ;;  %v1037_v4 = vstv %s1428_s3 }
 0x1eb   :  { %v819_v13 = vmax.f32 %v755_v8, 0.0  ;;  %v747_v16 = vadd.f32 %v1763_v15, %v1850_v25  ;;  %v816_v22 = vmax.f32 %v742_v10, 0.0  ;;  %v734_v25 = vadd.f32 %v1763_v15, %v1840_v58 }
 0x1ec   :  { %v1313_v34 = vpop.f32.mrf.mxu1  ;;  %v813_v30 = vmax.f32 %v731_v17, 0.0  ;;  %v723_v58 = vadd.f32 %v1811_v56, %v1763_v15 }
 0x1ed   :  { %1345 = vmatpush3.xpose.msra.mxu0 %v779_v29  ;;  %1364 = vmatpush3.xpose.msra.mxu1 %v803_v0  ;;  %v758_v61 = vadd.f32 %v1313_v34, %v1763_v15  ;;  %v817_v1 = vmax.f32 %v747_v16, 0.0  ;;  %v814_v29 = vmax.f32 %v734_v25, 0.0  ;;  %v812_v0 = vmax.f32 %v726_v11, 0.0 }
 0x1ee   :  { %v1858_v27 = vpop.f32.mrf.mxu1  ;;  %1346 = vmatprep.subr.mxu0 %v1441_v52  ;;  %1365 = vmatprep.subr.mxu1 %v1441_v52  ;;  %v811_v33 = vmax.f32 %v723_v58, 0.0  ;;  %v810_v34 = vmax.f32 %v718_v12, 0.0 }
 0x1ef   :  { %v820_v9 = vmax.f32 %v758_v61, 0.0  ;;  %v750_v14 = vadd.f32 %v1763_v15, %v1858_v27  ;;  %v809_v27 = vmax.f32 %v715_v63, 0.0 }
 0x1f0   :  { %v1316_v40 = vpop.f32.mrf.mxu1 }
 0x1f1   :  { %1347 = vmatpush3.xpose.msra.mxu0 %v778_v39  ;;  %1366 = vmatpush3.xpose.msra.mxu1 %v802_v2  ;;  %v771_v36 = vadd.f32 %v1316_v40, %v1763_v15  ;;  %v818_v19 = vmax.f32 %v750_v14, 0.0 }
 0x1f2   :  { %v762_v41 = vpop.f32.mrf.mxu1  ;;  %1348 = vmatprep.subr.mxu0 %v1441_v52  ;;  %1367 = vmatprep.subr.mxu1 %v1441_v52 }
 0x1f3   :  { %v823_v35 = vmax.f32 %v771_v36, 0.0  ;;  %v763_v55 = vadd.f32 %v1763_v15, %v762_v41 }
 0x1f4   :  { %v1317_v45 = vpop.f32.mrf.mxu1 }
 0x1f5   :  { %v774_v20 = vadd.f32 %v1317_v45, %v1763_v15  ;;  %1349 = vmatpush3.xpose.msra.mxu0 %v777_v42  ;;  %1368 = vmatpush3.xpose.msra.mxu1 %v801_v44  ;;  %v821_v62 = vmax.f32 %v763_v55, 0.0 }
 0x1f6   :  { %1369 = vmatprep.subr.mxu1 %v1441_v52  ;;  %1388 = vmatprep.subr.mxu0 %v1441_v52  ;;  %v765_v49 = vpop.f32.mrf.mxu1 }
 0x1f7   :  { %v824_v48 = vmax.f32 %v774_v20, 0.0  ;;  %v766_v31 = vadd.f32 %v1763_v15, %v765_v49 }
 0x1f8   :  { %1351 = vmatmul.mubr.f32.vlgmr.msra.gmra.mxu0 %v1874_v50 }
 0x1f9   :  { %1370 = vmatpush3.xpose.msra.mxu1 %v800_v47  ;;  %1389 = vmatpush3.xpose.msra.mxu0 %v824_v48  ;;  %v822_v59 = vmax.f32 %v766_v31, 0.0 }
 0x1fa   :  { %1371 = vmatprep.subr.mxu1 %v1441_v52  ;;  %1390 = vmatprep.subr.mxu0 %v1441_v52 }
 0x1fb   :  { %1420 = vmatprep.mubr.msk.f32.mxu0 %vm1442_vm1, %v1441_v52 }
 0x1fd   :  { %1372 = vmatpush3.xpose.msra.mxu1 %v799_v18  ;;  %1391 = vmatpush3.xpose.msra.mxu0 %v823_v35 }
 0x1fe   :  { %1373 = vmatprep.subr.mxu1 %v1441_v52  ;;  %1392 = vmatprep.subr.mxu0 %v1441_v52 }
 0x201   :  { %1374 = vmatpush3.xpose.msra.mxu1 %v798_v54  ;;  %1393 = vmatpush3.xpose.msra.mxu0 %v822_v59 }
 0x202   :  { %1375 = vmatprep.subr.mxu1 %v1441_v52  ;;  %1394 = vmatprep.subr.mxu0 %v1441_v52 }
 0x205   :  { %1376 = vmatpush3.xpose.msra.mxu1 %v797_v60  ;;  %1395 = vmatpush3.xpose.msra.mxu0 %v821_v62 }
 0x206   :  { %1377 = vmatprep.subr.mxu1 %v1441_v52  ;;  %1396 = vmatprep.subr.mxu0 %v1441_v52 }
 0x209   :  { %1378 = vmatpush3.xpose.msra.mxu1 %v796_v6  ;;  %1397 = vmatpush3.xpose.msra.mxu0 %v820_v9 }
 0x20a   :  { %1379 = vmatprep.subr.mxu1 %v1441_v52  ;;  %1398 = vmatprep.subr.mxu0 %v1441_v52 }
 0x20d   :  { %1380 = vmatpush3.xpose.msra.mxu1 %v795_v26  ;;  %1399 = vmatpush3.xpose.msra.mxu0 %v819_v13 }
 0x20e   :  { %1381 = vmatprep.subr.mxu1 %v1441_v52  ;;  %1400 = vmatprep.subr.mxu0 %v1441_v52 }
 0x211   :  { %1382 = vmatpush3.xpose.msra.mxu1 %v794_v5  ;;  %1401 = vmatpush3.xpose.msra.mxu0 %v818_v19 }
 0x212   :  { %1383 = vmatprep.subr.mxu1 %v1441_v52  ;;  %1402 = vmatprep.subr.mxu0 %v1441_v52 }
 0x215   :  { %1384 = vmatpush3.xpose.msra.mxu1 %v793_v28  ;;  %1403 = vmatpush3.xpose.msra.mxu0 %v817_v1 }
 0x216   :  { %1404 = vmatprep.subr.mxu0 %v1441_v52 }
 0x218   :  { %1386 = vmatmul.mubr.f32.vlgmr.msra.gmra.mxu1 %v1874_v50 }
 0x219   :  { %1405 = vmatpush3.xpose.msra.mxu0 %v816_v22 }
 0x21a   :  { %1406 = vmatprep.subr.mxu0 %v1441_v52 }
 0x21d   :  { %1407 = vmatpush3.xpose.msra.mxu0 %v815_v24 }
 0x21e   :  { %1408 = vmatprep.subr.mxu0 %v1441_v52 }
 0x221   :  { %1409 = vmatpush3.xpose.msra.mxu0 %v814_v29 }
 0x222   :  { %1410 = vmatprep.subr.mxu0 %v1441_v52 }
 0x225   :  { %1411 = vmatpush3.xpose.msra.mxu0 %v813_v30 }
 0x226   :  { %1412 = vmatprep.subr.mxu0 %v1441_v52 }
 0x229   :  { %1413 = vmatpush3.xpose.msra.mxu0 %v812_v0 }
 0x22a   :  { %1414 = vmatprep.subr.mxu0 %v1441_v52 }
 0x22d   :  { %1415 = vmatpush3.xpose.msra.mxu0 %v811_v33 }
 0x22e   :  { %1416 = vmatprep.subr.mxu0 %v1441_v52 }
 0x231   :  { %1417 = vmatpush3.xpose.msra.mxu0 %v810_v34 }
 0x232   :  { %1418 = vmatprep.subr.mxu0 %v1441_v52 }
 0x235   :  { %1419 = vmatpush3.xpose.msra.mxu0 %v809_v27 }
 0x238   :  { %1421 = vmatmul.mubr.f32.vlgmr.msra.gmra.mxu0 %v1874_v50 }
 0x2b8   :  { %v891_v56 = vpop.f32.mrf.mxu0 }
 0x2b9   :  { %v1039_v15 = vadd.f32 %v1037_v4, %v891_v56 }
 0x2ba   :  { %v1352_v38 = vpop.f32.mrf.mxu0 }
 0x2d8   :  { %v961_v39 = vpop.f32.mrf.mxu1 }
 0x2d9   :  { %v1040_v2 = vadd.f32 %v1037_v4, %v961_v39 }
 0x2da   :  { %v1387_v3 = vpop.f32.mrf.mxu1 }
 0x2db   :  { %v1045_v40 = vrot.slane %v1040_v2, 7 }
 0x2dd   :  { %v1047_v52 = vsel %vm1046_vm2, %v1045_v40, %v1039_v15 }
 0x2f8   :  { %v1031_v41 = vpop.f32.mrf.mxu0 }
 0x2f9   :  { %v1041_v42 = vadd.f32 %v1037_v4, %v1031_v41 }
 0x2fa   :  { %v1422_v57 = vpop.f32.mrf.mxu0 }
 0x2fb   :  { %v1048_v43 = vrot.slane %v1041_v42, 6 }
 0x2fd   :  { %v1050_v44 = vsel %vm1049_vm3, %v1048_v43, %v1047_v52 }
 0x2fe   :  { %1052 = vst [vmem:[%s1952_s4] sm:$0x7] %v1050_v44 }

</bundles_post_ra>
